<compile_context>
chip_gen: v6e
topology: v6e:2x2x1
jax: 0.10.0
libtpu: 0.0.40
codegen_flags: <defaults>
</compile_context>

<pallas_src>
import functools
import math

import numpy as np
import jax
import jax.numpy as jnp
from jax.experimental import pallas as pl
from jax.experimental.pallas import tpu as pltpu


# ----------------------------- small helpers ---------------------------------

def _vmem_capacity():
    """Physical VMEM bytes for this chip; conservative 64 MiB fallback (v7x)."""
    try:
        return int(pltpu.get_tpu_info().vmem_capacity_bytes)
    except Exception:
        return 64 * 1024 * 1024


def _largest_divisor_leq(total, cap):
    for d in range(min(total, cap), 0, -1):
        if total % d == 0:
            return d
    return 1


def _fir_2d_np(fir_kernel, factor, gain):
    k = np.asarray(fir_kernel, np.float32)
    if k.ndim == 1:
        k = np.outer(k, k)
    k = k / np.sum(k)
    return k * (gain * factor ** 2)


# ----------------------------- Pallas kernels --------------------------------

def _mixing_fold_kernel(x_ref, w_ref, b_ref, o_ref, *, tap_offsets, hwp):
    """Fused transpose-conv + FIR + bias, taps folded into the contraction dim.

    x_ref : (1, C_in, L)       flattened halo-padded input (bf16), L=(H+3)*Wp
    w_ref : (RB, 9*C_in)       bf16 fused weights; K-order = (tap, ci)
    b_ref : (RB, 1)            f32 bias (replicated per phase)
    o_ref : (1, RB, H*Wp)      lane-dense f32 output slab
    """
    xs = jnp.concatenate(
        [x_ref[0, :, off:off + hwp] for off in tap_offsets], axis=0)
    acc = jnp.dot(w_ref[...], xs, preferred_element_type=jnp.float32)
    o_ref[0] = (acc + b_ref[...]).astype(o_ref.dtype)


def _mixing_tap_kernel(x_ref, w_ref, b_ref, o_ref, *, tap_offsets, hwp):
    """Same computation as _mixing_fold_kernel, but one MXU dot per 3x3 tap
    (used when C_in is large enough that the stacked slab would blow VMEM).

    x_ref : (1, C_in, L) bf16, w_ref : (9, RB, C_in) bf16, b_ref : (RB, 1) f32.
    """
    off0 = tap_offsets[0]
    acc = jnp.dot(w_ref[0], x_ref[0, :, off0:off0 + hwp],
                  preferred_element_type=jnp.float32) + b_ref[...]
    for t in range(1, len(tap_offsets)):
        off = tap_offsets[t]
        acc = acc + jnp.dot(w_ref[t], x_ref[0, :, off:off + hwp],
                            preferred_element_type=jnp.float32)
    o_ref[0] = acc.astype(o_ref.dtype)


def _fir_phase_kernel(x_ref, o_ref, *, phase_taps, hwp):
    """Depthwise polyphase FIR upsample (use_conv=False), f32 VPU FMAs.

    x_ref : (1, CB, L)         flattened halo-padded input
    o_ref : (1, 4, CB, H*Wp)   one lane-dense slab per output phase
    phase_taps[p] = ((offset, weight), ...) -- static Python constants.
    The 9 unique shifted slabs are loaded once and reused across phases.
    """
    uniq = sorted({off for taps in phase_taps for off, _ in taps})
    slabs = {off: x_ref[0, :, off:off + hwp] for off in uniq}
    for p, taps in enumerate(phase_taps):
        acc = None
        for off, wv in taps:
            term = wv * slabs[off]
            acc = term if acc is None else acc + term
        o_ref[0, p] = acc.astype(o_ref.dtype)


# ----------------------------- pallas_call wrappers ---------------------------

def _mixing_conv_pallas(x_flat, w, bias2, hwp, wp, *, folded):
    n, c_in, L = x_flat.shape
    r = w.shape[0] if folded else w.shape[1]
    tap_offsets = tuple(u * wp + v for u in range(3) for v in range(3))

    cap = _vmem_capacity()
    budget = int(cap * 0.55)
    cap_rb = 256                      # v6e/v7x MXU tile height; shrink to fit
    while True:
        rb = _largest_divisor_leq(r, cap_rb)
        est = 2 * (c_in * L * x_flat.dtype.itemsize        # x (double-buffered)
                   + 9 * rb * c_in * 2                      # bf16 weights
                   + rb * 4                                 # bias
                   + rb * hwp * 4)                          # f32 output block
        if folded:
            est += 9 * c_in * hwp * 2                       # stacked K-slab
        if est <= budget or rb <= 8:
            break
        cap_rb = max(rb // 2, 1)
    nb = r // rb

    if folded:
        kernel = functools.partial(_mixing_fold_kernel,
                                   tap_offsets=tap_offsets, hwp=hwp)
        w_spec = pl.BlockSpec((rb, w.shape[1]), lambda i, j: (j, 0))
    else:
        kernel = functools.partial(_mixing_tap_kernel,
                                   tap_offsets=tap_offsets, hwp=hwp)
        w_spec = pl.BlockSpec((9, rb, c_in), lambda i, j: (0, j, 0))

    return pl.pallas_call(
        kernel,
        out_shape=jax.ShapeDtypeStruct((n, r, hwp), jnp.float32),
        grid=(n, nb),
        in_specs=[
            pl.BlockSpec((1, c_in, L), lambda i, j: (i, 0, 0)),  # const in j
            w_spec,
            pl.BlockSpec((rb, 1), lambda i, j: (j, 0)),
        ],
        out_specs=pl.BlockSpec((1, rb, hwp), lambda i, j: (i, j, 0)),
        compiler_params=pltpu.CompilerParams(
            dimension_semantics=("parallel", "parallel"),
            vmem_limit_bytes=int(cap * 0.75)),
    )(x_flat, w, bias2)


def _fir_upsample_pallas(x_flat, phase_taps, hwp):
    n, c, L = x_flat.shape
    cap = _vmem_capacity()
    budget = int(cap * 0.55)
    cap_cb = 256
    while True:
        cb = _largest_divisor_leq(c, cap_cb)
        est = (2 * (cb * L * 4 + 4 * cb * hwp * 4)   # x + 4-phase output blocks
               + 9 * cb * hwp * 4)                   # hoisted slice temporaries
        if est <= budget or cb <= 8:
            break
        cap_cb = max(cb // 2, 1)
    nb = c // cb

    kernel = functools.partial(_fir_phase_kernel, phase_taps=phase_taps, hwp=hwp)
    return pl.pallas_call(
        kernel,
        out_shape=jax.ShapeDtypeStruct((n, 4, c, hwp), x_flat.dtype),
        grid=(n, nb),
        in_specs=[pl.BlockSpec((1, cb, L), lambda i, j: (i, j, 0))],
        out_specs=pl.BlockSpec((1, 4, cb, hwp), lambda i, j: (i, 0, j, 0)),
        compiler_params=pltpu.CompilerParams(
            dimension_semantics=("parallel", "parallel"),
            vmem_limit_bytes=int(cap * 0.75)),
    )(x_flat)


# ----------------------------- module wrapper ---------------------------------

class FirUpsample2D:
    """JAX/Pallas port of diffusers FirUpsample2D.forward (factor=2, gain=1)."""

    def __init__(self, channels=None, out_channels=None, use_conv=False,
                 fir_kernel=(1, 3, 3, 1), key=None):
        out_channels = out_channels if out_channels else channels
        self.use_conv = use_conv
        self.fir_kernel = fir_kernel
        self.out_channels = out_channels

        K = _fir_2d_np(fir_kernel, 2, 1.0)              # static 4x4 (numpy)
        assert K.shape[0] == 4, "polyphase decomposition assumes a 4-tap FIR"
        self._Kf = K[::-1, ::-1]                        # upfirdn flips it

        if use_conv:
            # nn.Conv2d(channels, out_channels, 3, stride=1, padding=1) params,
            # initialized deterministically (kaiming-uniform style bound).
            kw_, kb_ = jax.random.split(key)
            fan_in = channels * 3 * 3
            bound = 1.0 / math.sqrt(fan_in)
            self.weight = jax.random.uniform(
                kw_, (out_channels, channels, 3, 3), jnp.float32, -bound, bound)
            self.bias = jax.random.uniform(
                kb_, (out_channels,), jnp.float32, -bound, bound)

            # --- hoisted composite-kernel construction (numpy, done once) ---
            # Compose conv_transpose2d(3x3, stride 2) with the 4x4 FIR into a
            # single 6x6 channel-mixing kernel E (correlation over the
            # zero-stuffed input) ...
            w_np = np.asarray(self.weight, np.float32)
            Kf = self._Kf
            e = np.zeros((out_channels, channels, 6, 6), np.float32)
            for a in range(4):
                for b in range(4):
                    e[:, :, a:a + 3, b:b + 3] += float(Kf[a, b]) * w_np
            # ... then split E into 4 polyphase 3x3 sub-kernels acting directly
            # on the halo-padded x (no zero-stuffing):
            #   out[o, 2m+pi, 2n+pj] =
            #     sum_{c,u,v} E[o, c, 2u+1-pi, 2v+1-pj] * x_pad[c, m+u, n+v]
            r = 4 * out_channels
            w9 = np.zeros((9, r, channels), np.float32)
            for pi in range(2):
                for pj in range(2):
                    p = 2 * pi + pj
                    sub = e[:, :, (1 - pi)::2, (1 - pj)::2]     # (co, ci, 3, 3)
                    sub = np.transpose(sub, (2, 3, 0, 1)).reshape(
                        9, out_channels, channels)
                    w9[:, p * out_channels:(p + 1) * out_channels, :] = sub

            # Fold the 9 taps into the contraction dim when C_in is small; the
            # stacked (9*C_in, hwp) slab stays VMEM-friendly across generations.
            self._fold = channels <= 128
            if self._fold:
                w_fold = np.transpose(w9, (1, 0, 2)).reshape(r, 9 * channels)
                self._w = jnp.asarray(w_fold, jnp.bfloat16)
            else:
                self._w = jnp.asarray(w9, jnp.bfloat16)
            self._bias2 = jnp.asarray(
                np.tile(np.asarray(self.bias, np.float32), 4).reshape(r, 1),
                jnp.float32)

    def __call__(self, x):
        n, c, h, w = x.shape
        wp0 = w + 2                 # padded row stride (1-pixel halo each side)
        # Lane alignment: pad wp so h*wp % 128 == 0 when overhead <= 12.5%.
        g = 128 // math.gcd(h, 128)
        wp_aligned = ((wp0 + g - 1) // g) * g
        wp = wp_aligned if (wp_aligned - wp0) * 8 <= wp0 else wp0
        hwp = h * wp
        pad_cfg = ((0, 0), (0, 0), (1, 2), (1, 1 + (wp - wp0)))

        if self.use_conv:
            c_out = self.out_channels
            # bf16 x for the MXU; the cast rides along with the halo pad.
            xp = jnp.pad(x.astype(jnp.bfloat16), pad_cfg)
            x_flat = xp.reshape(n, c, (h + 3) * wp)
            out_k = _mixing_conv_pallas(x_flat, self._w, self._bias2, hwp, wp,
                                        folded=self._fold)
            out_k = out_k.reshape(n, 2, 2, c_out, h, wp)[..., :w]
            return out_k.transpose(0, 3, 4, 1, 5, 2).reshape(
                n, c_out, 2 * h, 2 * w).astype(x.dtype)
        else:
            # upfirdn2d(x, K, up=2, pad=(2,1)) decomposed into 4 2x2 phase
            # kernels applied directly to the halo-padded x:
            #   out[c, 2m+pi, 2n+pj] =
            #     sum_{u,v in {0,1}} Kf[2u+pi, 2v+pj] * x_pad[c, m+pi+u, n+pj+v]
            Kf = self._Kf
            xp = jnp.pad(x, pad_cfg)
            x_flat = xp.reshape(n, c, (h + 3) * wp)
            phase_taps = []
            for pi in range(2):
                for pj in range(2):
                    taps = []
                    for u in range(2):
                        for v in range(2):
                            off = (pi + u) * wp + (pj + v)
                            taps.append((off, float(Kf[2 * u + pi, 2 * v + pj])))
                    phase_taps.append(tuple(taps))
            out_k = _fir_upsample_pallas(x_flat, tuple(phase_taps), hwp)
            out_k = out_k.reshape(n, 2, 2, c, h, wp)[..., :w]
            return out_k.transpose(0, 3, 4, 1, 5, 2).reshape(n, c, 2 * h, 2 * w)


# ----------------------------- pure-JAX reference -----------------------------

def _reference_use_conv(x, weight, bias, fir_kernel, factor=2, gain=1.0):
    K = jnp.asarray(_fir_2d_np(fir_kernel, factor, gain))
    # F.conv_transpose2d(x, flip-permuted weight, stride=2) == input-dilated
    # correlation with the original Conv2d weight, padding (k-1)=2.
    y = jax.lax.conv_general_dilated(
        x, weight, window_strides=(1, 1), padding=((2, 2), (2, 2)),
        lhs_dilation=(2, 2), dimension_numbers=("NCHW", "OIHW", "NCHW"))
    Kf = K[::-1, ::-1]
    c_out = weight.shape[0]
    wd = jnp.tile(Kf[None, None], (c_out, 1, 1, 1))
    out = jax.lax.conv_general_dilated(
        y, wd, window_strides=(1, 1), padding=((1, 1), (1, 1)),
        feature_group_count=c_out, dimension_numbers=("NCHW", "OIHW", "NCHW"))
    return out + bias.reshape(1, -1, 1, 1)


def _reference_no_conv(x, fir_kernel, factor=2, gain=1.0):
    K = jnp.asarray(_fir_2d_np(fir_kernel, factor, gain))
    Kf = K[::-1, ::-1]
    c = x.shape[1]
    wd = jnp.tile(Kf[None, None], (c, 1, 1, 1))
    return jax.lax.conv_general_dilated(
        x, wd, window_strides=(1, 1), padding=((2, 2), (2, 2)),
        lhs_dilation=(2, 2), feature_group_count=c,
        dimension_numbers=("NCHW", "OIHW", "NCHW"))


# ----------------------------------- main -------------------------------------

if __name__ == "__main__":
    key = jax.random.PRNGKey(0)
    kx, kp = jax.random.split(key)
    x = jax.random.normal(kx, (2, 4, 16, 16), jnp.float32)

    # use_conv=True path (fused transpose-conv + FIR + bias, bf16 MXU matmul).
    mod = FirUpsample2D(channels=4, out_channels=4, use_conv=True, key=kp)
    out = jax.block_until_ready(mod(x))
    assert out.shape == (2, 4, 32, 32)
    ref = _reference_use_conv(x, mod.weight, mod.bias, mod.fir_kernel)
    err = float(jnp.max(jnp.abs(out - ref)))
    # Tolerance relaxed vs the f32 version: bf16 matmul operands, f32 accumulate.
    assert err < 6e-2, f"use_conv=True mismatch: {err}"

    # use_conv=False path (pure polyphase FIR upsample, f32 VPU).
    mod2 = FirUpsample2D(channels=4, use_conv=False)
    out2 = jax.block_until_ready(mod2(x))
    assert out2.shape == (2, 4, 32, 32)
    ref2 = _reference_no_conv(x, mod2.fir_kernel)
    err2 = float(jnp.max(jnp.abs(out2 - ref2)))
    assert err2 < 1e-3, f"use_conv=False mismatch: {err2}"

    print("KERNEL_OK")
</pallas_src>

<mosaic_0001>
module attributes {stable_mosaic.version = 11 : i64} {
  func.func @_mixing_fold_kernel(%arg0: i32, %arg1: i32, %arg2: memref<1x4x342xbf16, #tpu.memory_space<vmem>>, %arg3: memref<16x36xbf16, #tpu.memory_space<vmem>>, %arg4: memref<16x1xf32, #tpu.memory_space<vmem>>, %arg5: memref<1x16x288xf32, #tpu.memory_space<vmem>>) attributes {dimension_semantics = [#tpu.dimension_semantics<parallel>, #tpu.dimension_semantics<parallel>], iteration_bounds = array<i64: 2, 1>, scalar_prefetch = 0 : i64, scratch_operands = 0 : i64, tpu.core_type = #tpu.core_type<tc>, window_params = [{transform_indices = @transform_0, window_bounds = array<i64: 1, 4, 342>}, {transform_indices = @transform_1, window_bounds = array<i64: 16, 36>}, {transform_indices = @transform_2, window_bounds = array<i64: 16, 1>}, {transform_indices = @transform_3, window_bounds = array<i64: 1, 16, 288>}]} {
    %c0 = arith.constant 0 : index
    %c0_0 = arith.constant 0 : index
    %c0_1 = arith.constant 0 : index
    %0 = vector.load %arg2[%c0, %c0_0, %c0_1] : memref<1x4x342xbf16, #tpu.memory_space<vmem>>, vector<1x4x288xbf16>
    %1 = vector.shape_cast %0 : vector<1x4x288xbf16> to vector<4x288xbf16>
    %c0_2 = arith.constant 0 : index
    %c0_3 = arith.constant 0 : index
    %c1 = arith.constant 1 : index
    %2 = vector.load %arg2[%c0_2, %c0_3, %c1] : memref<1x4x342xbf16, #tpu.memory_space<vmem>>, vector<1x4x288xbf16>
    %3 = vector.shape_cast %2 : vector<1x4x288xbf16> to vector<4x288xbf16>
    %c0_4 = arith.constant 0 : index
    %c0_5 = arith.constant 0 : index
    %c2 = arith.constant 2 : index
    %4 = vector.load %arg2[%c0_4, %c0_5, %c2] : memref<1x4x342xbf16, #tpu.memory_space<vmem>>, vector<1x4x288xbf16>
    %5 = vector.shape_cast %4 : vector<1x4x288xbf16> to vector<4x288xbf16>
    %c0_6 = arith.constant 0 : index
    %c0_7 = arith.constant 0 : index
    %c18 = arith.constant 18 : index
    %6 = vector.load %arg2[%c0_6, %c0_7, %c18] : memref<1x4x342xbf16, #tpu.memory_space<vmem>>, vector<1x4x288xbf16>
    %7 = vector.shape_cast %6 : vector<1x4x288xbf16> to vector<4x288xbf16>
    %c0_8 = arith.constant 0 : index
    %c0_9 = arith.constant 0 : index
    %c19 = arith.constant 19 : index
    %8 = vector.load %arg2[%c0_8, %c0_9, %c19] : memref<1x4x342xbf16, #tpu.memory_space<vmem>>, vector<1x4x288xbf16>
    %9 = vector.shape_cast %8 : vector<1x4x288xbf16> to vector<4x288xbf16>
    %c0_10 = arith.constant 0 : index
    %c0_11 = arith.constant 0 : index
    %c20 = arith.constant 20 : index
    %10 = vector.load %arg2[%c0_10, %c0_11, %c20] : memref<1x4x342xbf16, #tpu.memory_space<vmem>>, vector<1x4x288xbf16>
    %11 = vector.shape_cast %10 : vector<1x4x288xbf16> to vector<4x288xbf16>
    %c0_12 = arith.constant 0 : index
    %c0_13 = arith.constant 0 : index
    %c36 = arith.constant 36 : index
    %12 = vector.load %arg2[%c0_12, %c0_13, %c36] : memref<1x4x342xbf16, #tpu.memory_space<vmem>>, vector<1x4x288xbf16>
    %13 = vector.shape_cast %12 : vector<1x4x288xbf16> to vector<4x288xbf16>
    %c0_14 = arith.constant 0 : index
    %c0_15 = arith.constant 0 : index
    %c37 = arith.constant 37 : index
    %14 = vector.load %arg2[%c0_14, %c0_15, %c37] : memref<1x4x342xbf16, #tpu.memory_space<vmem>>, vector<1x4x288xbf16>
    %15 = vector.shape_cast %14 : vector<1x4x288xbf16> to vector<4x288xbf16>
    %c0_16 = arith.constant 0 : index
    %c0_17 = arith.constant 0 : index
    %c38 = arith.constant 38 : index
    %16 = vector.load %arg2[%c0_16, %c0_17, %c38] : memref<1x4x342xbf16, #tpu.memory_space<vmem>>, vector<1x4x288xbf16>
    %17 = vector.shape_cast %16 : vector<1x4x288xbf16> to vector<4x288xbf16>
    %18 = tpu.concatenate %1, %3, %5, %7, %9, %11, %13, %15, %17 in 0 : vector<4x288xbf16>, vector<4x288xbf16>, vector<4x288xbf16>, vector<4x288xbf16>, vector<4x288xbf16>, vector<4x288xbf16>, vector<4x288xbf16>, vector<4x288xbf16>, vector<4x288xbf16> -> vector<36x288xbf16>
    %c0_18 = arith.constant 0 : index
    %c0_19 = arith.constant 0 : index
    %19 = vector.load %arg3[%c0_18, %c0_19] : memref<16x36xbf16, #tpu.memory_space<vmem>>, vector<16x36xbf16>
    %cst = arith.constant dense<0.000000e+00> : vector<16x288xf32>
    %20 = tpu.matmul %19, %18, %cst {dimension_numbers = #tpu.dot_dimension_numbers<[1], [0], [0], [1], [0, 0, 1, 1], [], []>} : vector<16x36xbf16>, vector<36x288xbf16>, vector<16x288xf32> -> vector<16x288xf32>
    %c0_20 = arith.constant 0 : index
    %c0_21 = arith.constant 0 : index
    %21 = vector.load %arg4[%c0_20, %c0_21] : memref<16x1xf32, #tpu.memory_space<vmem>>, vector<16x1xf32>
    %22 = vector.broadcast %21 : vector<16x1xf32> to vector<16x288xf32>
    %23 = arith.addf %20, %22 : vector<16x288xf32>
    %c0_22 = arith.constant 0 : index
    %c0_23 = arith.constant 0 : index
    %c0_24 = arith.constant 0 : index
    %24 = vector.load %arg5[%c0_22, %c0_23, %c0_24] : memref<1x16x288xf32, #tpu.memory_space<vmem>>, vector<1x16x288xf32>
    %25 = vector.shape_cast %24 : vector<1x16x288xf32> to vector<16x288xf32>
    %26 = vector.shape_cast %23 : vector<16x288xf32> to vector<1x16x288xf32>
    tpu.vector_store %arg5[%c0_22, %c0_23, %c0_24], %26 {strides = array<i32>} : memref<1x16x288xf32, #tpu.memory_space<vmem>>, vector<1x16x288xf32>,
    return
  }
  func.func @transform_0(%arg0: i32, %arg1: i32) -> (i32, i32, i32) {
    %c0_i32 = arith.constant 0 : i32
    %c0_i32_0 = arith.constant 0 : i32
    %c0_i32_1 = arith.constant 0 : i32
    return %arg0, %c0_i32, %c0_i32_0 : i32, i32, i32
  }
  func.func @transform_1(%arg0: i32, %arg1: i32) -> (i32, i32) {
    %c0_i32 = arith.constant 0 : i32
    %c0_i32_0 = arith.constant 0 : i32
    return %arg1, %c0_i32 : i32, i32
  }
  func.func @transform_2(%arg0: i32, %arg1: i32) -> (i32, i32) {
    %c0_i32 = arith.constant 0 : i32
    %c0_i32_0 = arith.constant 0 : i32
    return %arg1, %c0_i32 : i32, i32
  }
  func.func @transform_3(%arg0: i32, %arg1: i32) -> (i32, i32, i32) {
    %c0_i32 = arith.constant 0 : i32
    %c0_i32_0 = arith.constant 0 : i32
    return %arg0, %arg1, %c0_i32 : i32, i32, i32
  }
}

</mosaic_0001>

<bundles_post_ra>
// kernel: tpu_custom_call.1
= control target key start
LH: loop header
LB: loop body
LE: loop exit
PB: predicated region body
PF: predicated region fallthrough
CT: control target
= control target key end

     0   :  { %8 = vsyncpa [#allocation3], 0  ;;  %s1097_s0 = inlined_call_operand.vmem [shape: bf16[2,4,342], index: 0, kind: input, shape index: {}]   ;;  %s1098_s1 = inlined_call_operand.hbm [shape: bf16[16,36], index: 1, kind: input, shape index: {}]   ;;  %s1099_s2 = inlined_call_operand.vmem [shape: f32[16,1], index: 2, kind: input, shape index: {}]   ;;  %s1100_s3 = inlined_call_operand.hbm [shape: f32[2,16,288], index: 3, kind: output, shape index: {}]  }
   0x1   :  { %9 = vsyncpa [#allocation4], 0 }
   0x2   :  { %11 = vsyncpa [#allocation4 + $0x1], 0  ;;  %s892_s12 = smov 0   ;;  %s894_s13 = smov 0  }
   0x3   :  { %s896_s14 = smov 0   ;;  %s898_s15 = smov 0  }
   0x4   :  { %s900_s16 = smov 0   ;;  %s902_s17 = smov 0  }
   0x5 LB: > { %s626_s18 = sadd.s32 4294967295, %s852_s17   ;;  %s627_s19 = sadd.s32 4294967294, %s852_s17   ;;  %s852_s17 = sphi %s902_s17, %s17_s17   ;;  %s848_s16 = sphi %s900_s16, %s1109_s16   ;;  %s844_s15 = sphi %s898_s15, %s1108_s15   ;;  %s840_s14 = sphi %s896_s14, %s1107_s14   ;;  %s836_s13 = sphi %s894_s13, %s1106_s13   ;;  %s832_s12 = sphi %s892_s12, %s1105_s12  }
   0x6   : > { %s29_s20 = sadd.s32 1, %s848_s16  ;;  %s116_s21 = sadd.s32 1, %s840_s14 }
   0x7   : > { %p31_p0 = scmp.ge.s32.totalorder %s29_s20, 2  ;;  %p126_p1 = scmp.ne.s32.totalorder %s840_s14, %s836_s13 }
   0x8   : > { %p127_p2 = scmp.eq.s32.totalorder %s626_s18, 1  ;;  %p132_p3 = scmp.ne.s32.totalorder %s836_s13, %s832_s12 }
   0x9   : > { %s1111_s20 = smov (%p31_p0, %s29_s20), 0  ;;  %p133_p5 = scmp.eq.s32.totalorder %s627_s19, 1 }
   0xa   : > { %p932_p4 = por %p127_p2, %p126_p1  ;;  %s111_s23 = ssub.s32 %s848_s16, %s1111_s20 }
   0xb   : > { %p628_p6 = scmp.ge.s32.totalorder %s852_s17, 1  ;;  %p114_p7 = scmp.eq.s32.totalorder %s111_s23, 0 }
   0xc   : > { %p939_p8 = por %p133_p5, %p132_p3  ;;  %p140_p9 = scmp.lt.s32.totalorder %s852_s17, 3 }
   0xd   : > { %s945_s25 = scalar_select %p114_p7, %s840_s14, %s116_s21  }
   0xe   : > { %p947_p10 = pnand %p628_p6, %p140_p9  ;;  %p951_p11 = scmp.eq.s32.totalorder %s626_s18, 0 }
   0xf   : > { %s854_s28 = smov [#allocation2]  }
  0x10   : > { %p665_p12 = pneg %p947_p10  ;;  %s155_s29 = sshll.u32 %s854_s28, 4  ;;  %s156_s29 = int_to_ptr.vmem [resolvable:$true] %s155_s29 }
  0x11   : > { %s757_s30 = scalar_lea.vmem %s156_s29, 128  ;;  %p765_p5 = scmp.lt.s32.totalorder %s156_s29, %s156_s29 }
  0x12   : > { %p666_p13 = pnand %p951_p11, %p665_p12  ;;  %p758_p1 = scmp.ne.s32.totalorder %s156_s29, %s757_s30 }
  0x13   : > { %p766_p6 = scmp.lt.s32.totalorder %s757_s30, %s757_s30 }
  0x14   : > { %p748_p0 = pneg %p666_p13 }
  0x15   : > { %p767_p7 = por %p766_p6, %p765_p5 }
  0x16   : > { %p760_p2 = pnand %p758_p1, %p748_p0 }
  0x18   : > { %p761_p3 = pneg %p760_p2 }
  0x1a   : > { %p768_p9 = pnand %p767_p7, %p761_p3 }
  0x1c   : > { %771 = shalt.err (!%p768_p9)
}
  0x1d   : > { %s855_s4 = smov 64   ;;  %s856_s5 = smov 4  }
  0x1e   : > { %668 = dma.hbm_to_vmem [thread:$0]  (!%p666_p13), %s1098_s1, 128, %s156_s29, [#allocation3], %s855_s4, %s855_s4, %s856_s5  }
  0x1f   : > { %188 = sbr.rel (%p947_p10) target bundleno = 427 (0x1ab), region = 32 }
  0x24   : > { %823 = dma.done.wait (%p951_p11), [#allocation3], 128  }
  0x25   : > { %825 = vsyncadd (%p951_p11), [#allocation3], 4294967168  ;;  %p217_p12 = scmp.lt.s32.totalorder %s844_s15, 1  ;;  %v237_v0 = vlaneseq  ;;  %v857_v1 = vmov 1983009808   ;;  %v858_v4 = vmov 0.0  }
  0x26   : > { %v235_v2 = vunpack.c.l.s4 %v857_v1  ;;  %646 = vmatprep.subr.bf16.mxu1 %v858_v4  ;;  %s859_s19 = smov 109   ;;  %s860_s21 = smov 90   ;;  %vm865_vm0 = vmmov 0   ;;  %v867_v18 = vmov 0   ;;  %v386_v19 = vld [vmem:[%s1099_s2] sm:$0xff]  ;;  %v387_v20 = vld [vmem:[%s1099_s2 + $0x8] sm:$0xff] }
  0x27   : > { %s218_s8 = scalar_select %p217_p12, %s844_s15, 1  ;;  %v238_v3 = vshrl.u32 %v237_v0, 7  ;;  %652 = vmatprep.mubr.msk.bf16.mxu1 %vm865_vm0, %v858_v4  ;;  %448 = vmatprep.mubr.bf16.mxu0 %v867_v18  ;;  %vm333_vm1 = vcmask 1041408   ;;  %vm330_vm2 = vcmask 736256   ;;  %vm303_vm3 = vcmask 883712  }
  0x28   : > { %v236_v5 = vunpack.c.0.s8 %v235_v2  ;;  %s861_s23 = smov 108   ;;  %s862_s26 = smov 92   ;;  %741 = vset.pattern.permute.xlu0 %v867_v18  ;;  %742 = vset.pattern.permute.xlu1 %v867_v18  ;;  %vm312_vm4 = vcmask 752640   ;;  %vm294_vm5 = vcmask 891904   ;;  %vm343_vm6 = vcmask 1043456  }
  0x29   : > { %s657_s9 = smul.u32 6, %s218_s8  ;;  %s863_s27 = smov 91   ;;  %vm321_vm7 = vcmask 744448   ;;  %vm350_vm8 = vcmask 1045504   ;;  %vm264_vm9 = vcmask 1039360   ;;  %vm275_vm10 = vcmask 1031168  }
  0x2a   : > { %v239_v6 = vsub.s32 %v236_v5, %v238_v3  ;;  %s864_s28 = smov 127   ;;  %s866_s29 = smov 126   ;;  %vm285_vm11 = vcmask 900096   ;;  %vm403_vm12 = vcmask 293888   ;;  %vm502_vm13 = vcmask 261120  }
  0x2b   : > { %s221_s18 = scalar_lea.vmem %s1097_s0, %s657_s9  ;;  %s868_s30 = smov 110  }
  0x2c   : > { %v231_v7 = vld [vmem:[%s221_s18] sm:$0x3f]  ;;  %s214_s8 = sand.u32 1, %s836_s13   ;;  %s658_s11 = smul.u32 768, %s844_s15 }
  0x2d   : > { %v974_v8 = vrot.slane %v231_v7, %v239_v6  ;;  %v233_v9 = vcombine.high %v231_v7, %v231_v7  ;;  %v249_v11 = vcombine.low %v231_v7, %v231_v7  ;;  %s656_s9 = smul.u32 48, %s214_s8 }
  0x2f   : > { %288 = vrot.lane.b32.xlu1 %v974_v8, %s859_s19  ;;  %324 = vrot.lane.b32.xlu0 %v974_v8, %s860_s21  ;;  %v978_v10 = vrot.slane %v233_v9, %v239_v6  ;;  %v984_v12 = vcombine.high %v974_v8, %v974_v8  ;;  %v256_v13 = vrot.slane %v249_v11, %v239_v6  ;;  %s216_s10 = scalar_lea.vmem [#allocation5], %s656_s9 }
  0x30   : > { %v267_v15 = vcombine.low %v974_v8, %v974_v8  ;;  %s524_s18 = sshll.u32 %s216_s10, 4  ;;  %s1043_s18 = int_to_ptr.vmem [resolvable:$true] %s524_s18 }
  0x31   : > { %v257_v14 = vcombine.high %v256_v13, %v256_v13  ;;  %v268_v16 = vcombine.low %v978_v10, %v978_v10  ;;  %v278_v17 = vcombine.low %v256_v13, %v256_v13 }
  0x33   : > { %301 = vrot.lane.b32.xlu0 %v974_v8, %s861_s23  ;;  %328 = vrot.lane.b32.xlu1 %v978_v10, %s860_s21 }
  0x37   : > { %326 = vrot.lane.b32.xlu0 %v984_v12, %s860_s21  ;;  %290 = vrot.lane.b32.xlu1 %v984_v12, %s859_s19  ;;  %s1048_s21 = scalar_lea.hbm %s1100_s3, %s658_s11 }
  0x3b   : > { %292 = vrot.lane.b32.xlu0 %v978_v10, %s859_s19  ;;  %299 = vrot.lane.b32.xlu1 %v257_v14, %s861_s23 }
  0x3f   : > { %297 = vrot.lane.b32.xlu0 %v256_v13, %s861_s23  ;;  %308 = vrot.lane.b32.xlu1 %v974_v8, %s862_s26  ;;  %s1052_s23 = scalar_lea.sflag [#allocation4], %s214_s8 }
  0x43   : > { %306 = vrot.lane.b32.xlu1 %v267_v15, %s862_s26  ;;  %310 = vrot.lane.b32.xlu0 %v268_v16, %s862_s26  ;;  %s772_s26 = scalar_lea.vmem %s1043_s18, 768 }
  0x44   : > { %p773_p10 = scmp.ne.s32.totalorder %s1043_s18, %s772_s26 }
  0x46   : > { %p774_p11 = pnand %p773_p10, %p932_p4 }
  0x47   : > { %319 = vrot.lane.b32.xlu1 %v267_v15, %s863_s27  ;;  %317 = vrot.lane.b32.xlu0 %v256_v13, %s863_s27 }
  0x48   : > { %p775_p13 = pneg %p774_p11 }
  0x4b   : > { %260 = vrot.lane.b32.xlu1 %v257_v14, %s864_s28  ;;  %315 = vrot.lane.b32.xlu0 %v278_v17, %s863_s27  ;;  %s869_s27 = smov [#allocation5]  }
  0x4f   : > { %258 = vrot.lane.b32.xlu1 %v256_v13, %s864_s28  ;;  %262 = vrot.lane.b32.xlu0 %v974_v8, %s864_s28  ;;  %s776_s28 = sshll.u32 %s869_s27, 4  ;;  %s777_s28 = int_to_ptr.vmem [resolvable:$false] %s776_s28 }
  0x50   : > { %p779_p0 = scmp.lt.s32.totalorder %s1043_s18, %s777_s28 }
  0x53   : > { %273 = vrot.lane.b32.xlu1 %v268_v16, %s866_s29  ;;  %271 = vrot.lane.b32.xlu0 %v974_v8, %s866_s29 }
  0x57   : > { %281 = vrot.lane.b32.xlu1 %v256_v13, %s868_s30  ;;  %269 = vrot.lane.b32.xlu0 %v267_v15, %s866_s29  ;;  %s778_s29 = scalar_lea.vmem %s777_s28, 1536 }
  0x58   : > { %p780_p1 = scmp.lt.s32.totalorder %s778_s29, %s772_s26 }
  0x5a   : > { %p781_p2 = por %p780_p1, %p779_p0 }
  0x5b   : > { %279 = vrot.lane.b32.xlu1 %v278_v17, %s868_s30  ;;  %283 = vrot.lane.b32.xlu0 %v267_v15, %s868_s30  ;;  %v745_v17 = vld [vmem:[#allocation2] sm:$0xff]  }
  0x5c   : > { %p782_p3 = pnand %p781_p2, %p775_p13 }
  0x5f   : > { %390 = vperm.xlu0 %741, %v386_v19   ;;  %395 = vperm.xlu1 %742, %v387_v20  }
  0xa1   : > { %v289_v21 = vpop.permute.xlu1 %288  ;;  %v325_v22 = vpop.permute.xlu0 %324 }
  0xa5   : > { %v302_v23 = vpop.permute.xlu0 %301  ;;  %v329_v24 = vpop.permute.xlu1 %328 }
  0xa6   : > { %v414_v25 = vsel %vm333_vm1, %v329_v24, 0 }
  0xa7   : > { %647 = vmatpush3.bf16.msra.mxu1 %v414_v25 }
  0xa8   : > { %648 = vmatprep.subr.bf16.mxu1 %v858_v4 }
  0xa9   : > { %v327_v26 = vpop.permute.xlu0 %326  ;;  %v291_v27 = vpop.permute.xlu1 %290 }
  0xaa   : > { %v332_v28 = vsel %vm330_vm2, %v327_v26, %v329_v24  ;;  %v331_v29 = vsel %vm330_vm2, %v325_v22, %v327_v26  ;;  %v295_v51 = vsel %vm294_vm5, %v289_v21, %v291_v27 }
  0xab   : > { %636 = vmatprep.subr.msk.bf16.mxu0 %vm333_vm1, %v332_v28  ;;  %v408_v30 = vsel %vm333_vm1, %v331_v29, 0 }
  0xac   : > { %427 = vmatpush1.bf16.msra.mxu0 %v408_v30 }
  0xad   : > { %v293_v31 = vpop.permute.xlu0 %292  ;;  %v300_v32 = vpop.permute.xlu1 %299 }
  0xae   : > { %v296_v37 = vsel %vm294_vm5, %v291_v27, %v293_v31  ;;  %v305_v38 = vsel %vm303_vm3, %v300_v32, %v302_v23  ;;  %v368_v40 = vsel %vm333_vm1, %v293_v31, %v302_v23 }
  0xaf   : > { %v365_v41 = vsel %vm333_vm1, %v296_v37, %v305_v38 }
  0xb1   : > { %v298_v33 = vpop.permute.xlu0 %297  ;;  %v309_v34 = vpop.permute.xlu1 %308 }
  0xb2   : > { %v304_v45 = vsel %vm303_vm3, %v298_v33, %v300_v32 }
  0xb3   : > { %v362_v52 = vsel %vm333_vm1, %v295_v51, %v304_v45 }
  0xb5   : > { %v307_v35 = vpop.permute.xlu1 %306  ;;  %v311_v36 = vpop.permute.xlu0 %310 }
  0xb6   : > { %v314_v39 = vsel %vm312_vm4, %v309_v34, %v311_v36  ;;  %v374_v42 = vsel %vm343_vm6, %v368_v40, %v311_v36  ;;  %v313_v49 = vsel %vm312_vm4, %v307_v35, %v309_v34 }
  0xb7   : > { %v372_v48 = vsel %vm343_vm6, %v365_v41, %v314_v39  ;;  %v370_v56 = vsel %vm343_vm6, %v362_v52, %v313_v49 }
  0xb9   : > { %v320_v43 = vpop.permute.xlu1 %319  ;;  %v318_v44 = vpop.permute.xlu0 %317 }
  0xba   : > { %v323_v46 = vsel %vm321_vm7, %v318_v44, %v320_v43  ;;  %v382_v47 = vsel %vm350_vm8, %v374_v42, %v320_v43 }
  0xbb   : > { %649 = vmatpush3.bf16.msra.mxu1 %v382_v47  ;;  %v379_v50 = vsel %vm350_vm8, %v372_v48, %v323_v46 }
  0xbc   : > { %428 = vmatprep.subr.bf16.mxu0 %v379_v50  ;;  %650 = vmatprep.subr.bf16.mxu1 %v858_v4 }
  0xbd   : > { %v261_v53 = vpop.permute.xlu1 %260  ;;  %v316_v54 = vpop.permute.xlu0 %315 }
  0xbe   : > { %v322_v55 = vsel %vm321_vm7, %v316_v54, %v318_v44 }
  0xbf   : > { %v376_v57 = vsel %vm350_vm8, %v370_v56, %v322_v55 }
  0xc0   : > { %429 = vmatpush1.bf16.msra.mxu0 %v376_v57 }
  0xc1   : > { %v259_v58 = vpop.permute.xlu1 %258  ;;  %v263_v59 = vpop.permute.xlu0 %262 }
  0xc2   : > { %v266_v62 = vsel %vm264_vm9, %v261_v53, %v263_v59  ;;  %v265_v1 = vsel %vm264_vm9, %v259_v58, %v261_v53  ;;  %v342_v5 = vsel %vm333_vm1, %v978_v10, %v263_v59 }
  0xc3   : > { %v339_v4 = vsel %vm333_vm1, %v984_v12, %v266_v62  ;;  %v336_v6 = vsel %vm333_vm1, %v974_v8, %v265_v1 }
  0xc5   : > { %v274_v60 = vpop.permute.xlu1 %273  ;;  %v272_v61 = vpop.permute.xlu0 %271 }
  0xc6   : > { %v277_v2 = vsel %vm275_vm10, %v272_v61, %v274_v60  ;;  %v349_v7 = vsel %vm343_vm6, %v342_v5, %v274_v60 }
  0xc7   : > { %v347_v13 = vsel %vm343_vm6, %v339_v4, %v277_v2 }
  0xc9   : > { %v282_v63 = vpop.permute.xlu1 %281  ;;  %v270_v0 = vpop.permute.xlu0 %269 }
  0xca   : > { %v276_v3 = vsel %vm275_vm10, %v270_v0, %v272_v61 }
  0xcb   : > { %v345_v12 = vsel %vm343_vm6, %v336_v6, %v276_v3 }
  0xcd   : > { %v280_v9 = vpop.permute.xlu1 %279  ;;  %v284_v11 = vpop.permute.xlu0 %283 }
  0xce   : > { %v286_v14 = vsel %vm285_vm11, %v280_v9, %v282_v63  ;;  %v287_v15 = vsel %vm285_vm11, %v282_v63, %v284_v11  ;;  %v358_v16 = vsel %vm350_vm8, %v349_v7, %v284_v11 }
  0xcf   : > { %651 = vmatpush3.bf16.msra.mxu1 %v358_v16  ;;  %v355_v10 = vsel %vm350_vm8, %v347_v13, %v287_v15  ;;  %v352_v8 = vsel %vm350_vm8, %v345_v12, %v286_v14 }
  0xd0   : > { %430 = vmatprep.subr.bf16.mxu0 %v355_v10 }
  0xd1   : > { %431 = vmatpush1.bf16.msra.mxu0 %v352_v8 }
  0xd2   : > { %653 = vmatmul.mubr.msk.bf16.vlgmr.msra.gmra.mxu1 %vm403_vm12, %v745_v17 }
  0xd4   : > { %637 = vmatmul.mubr.msk.bf16.vlgmr.msra.gmra.mxu0 %vm403_vm12, %v745_v17 }
  0xda   : > { %v391_v19 = vpop.permute.xlu0 %390  ;;  %v396_v21 = vpop.permute.xlu1 %395 }
 0x192   : > { %v493_v18 = vpop.f32.mrf.mxu1 }
 0x193   : > { %v494_v20 = vadd.f32 %v493_v18, %v391_v19 }
 0x194   : > { %v450_v22 = vpop.f32.mrf.mxu0  ;;  %v654_v23 = vpop.f32.mrf.mxu1 }
 0x195   : > { %v451_v24 = vadd.f32 %v450_v22, %v391_v19  ;;  %503 = vst.msk [vmem:[%s216_s10 + $0x10] sm:$0xff] %vm502_vm13, %v494_v20 }
 0x196   : > { %v452_v25 = vpop.f32.mrf.mxu0  ;;  %v496_v26 = vpop.f32.mrf.mxu1 }
 0x197   : > { %500 = vst [vmem:[%s216_s10] sm:$0xff] %v451_v24  ;;  %v453_v27 = vadd.f32 %v452_v25, %v391_v19  ;;  %v497_v28 = vadd.f32 %v496_v26, %v396_v21 }
 0x198   : > { %v454_v29 = vpop.f32.mrf.mxu0  ;;  %v655_v30 = vpop.f32.mrf.mxu1 }
 0x199   : > { %501 = vst [vmem:[%s216_s10 + $0x8] sm:$0xff] %v453_v27  ;;  %506 = vst.msk [vmem:[%s216_s10 + $0x28] sm:$0xff] %vm502_vm13, %v497_v28  ;;  %v455_v31 = vadd.f32 %v454_v29, %v396_v21 }
 0x19a   : > { %v456_v32 = vpop.f32.mrf.mxu0 }
 0x19b   : > { %504 = vst [vmem:[%s216_s10 + $0x18] sm:$0xff] %v455_v31  ;;  %v457_v33 = vadd.f32 %v456_v32, %v396_v21 }
 0x19d   : > { %505 = vst [vmem:[%s216_s10 + $0x20] sm:$0xff] %v457_v33 }
 0x19e   : > { %785 = shalt.err (!%p782_p3)
}
 0x19f   : > { %s786_s30 = scalar_lea.hbm %s1048_s21, 768  ;;  %s790_s6 = scalar_lea.hbm %s1100_s3, 1536 }
 0x1a0   : > { %p787_p5 = scmp.ne.s32.totalorder %s1048_s21, %s786_s30  ;;  %p791_p9 = scmp.lt.s32.totalorder %s1048_s21, %s1100_s3 }
 0x1a1   : > { %p792_p12 = scmp.lt.s32.totalorder %s790_s6, %s786_s30 }
 0x1a2   : > { %p788_p6 = pnand %p787_p5, %p932_p4 }
 0x1a3   : > { %p793_p10 = por %p792_p12, %p791_p9 }
 0x1a4   : > { %p789_p7 = pneg %p788_p6 }
 0x1a6   : > { %p794_p11 = pnand %p793_p10, %p789_p7 }
 0x1a8   : > { %797 = shalt.err (!%p794_p11)
}
 0x1a9   : > { %s870_s9 = smov 384   ;;  %s871_s10 = smov 24  }
 0x1aa   : > { %663 = dma.vmem_to_hbm [thread:$0]  (%p932_p4), %s1043_s18, 768, %s1048_s21, %s1052_s23, %s870_s9, %s870_s9, %s871_s10  }
 0x1ab PF: > { %p675_p13 = scmp.ge.s32.totalorder %s852_s17, 2  ;;  %s539_s11 = sand.u32 1, %s832_s12  }
 0x1ac   : > { %s540_s19 = scalar_lea.sflag [#allocation4], %s539_s11 }
 0x1ad   : > { %p670_p0 = pnand %p675_p13, %p939_p8 }
 0x1af   : > { %p671_p1 = pneg %p670_p0 }
 0x1b1   : > { %827 = dma.done.wait (%p671_p1), %s540_s19, 768  }
 0x1b2   : > { %829 = vsyncadd (%p671_p1), %s540_s19, 4294966528  ;;  %s17_s17 = sadd.s32 1, %s852_s17   ;;  %s1105_s12 = smov %s836_s13 }
 0x1b3   : > { %p14_p2 = scmp.ge.s32.totalorder %s17_s17, 4   ;;  %s1106_s13 = smov %s840_s14 }
 0x1b4   : > { %s1107_s14 = smov %s945_s25  ;;  %s1108_s15 = smov %s848_s16 }
 0x1b5   : > { %s1109_s16 = smov %s1111_s20  ;;  %16 = sbr.rel (!%p14_p2) target bundleno = 5 (0x5), region = 76 }
 0x1ba   :  { %545 = vsyncpa [#allocation3], 1 }
 0x1bb   :  { %547 = vsyncpa [#allocation3 + $0x1], 1 }
 0x1bc   :  { %548 = vsyncpa [#allocation4], 1 }
 0x1bd   :  { %550 = vsyncpa [#allocation4 + $0x1], 1 }

</bundles_post_ra>
